<compile_context>
chip_gen: v7x
topology: tpu7x:2x2x1
jax: 0.10.0
libtpu: 0.0.40
codegen_flags: <defaults>
</compile_context>

<pallas_src>
import jax
import jax.numpy as jnp
import numpy as np
from jax import lax
from jax.experimental import pallas as pl
from jax.experimental.pallas import tpu as pltpu


def _round_up(x, m):
    return (x + m - 1) // m * m


def _mf_kernel(u_idx_ref, i_idx_ref,      # SMEM scalar-prefetch: (b_pad,) int32
               u_tab_ref, i_tab_ref,      # whole embedding tables, VMEM-resident
               r_ref, usrc_ref, isrc_ref):
    tb = usrc_ref.shape[0]
    base = pl.program_id(0) * tb

    # Direct per-row gather: dynamic first-axis loads from the resident tables,
    # rows written straight into the coalesced (tb, F) output tiles.
    def gather_row(r, carry):
        u_idx = u_idx_ref[base + r]
        i_idx = i_idx_ref[base + r]
        usrc_ref[r, :] = u_tab_ref[u_idx, :]
        isrc_ref[r, :] = i_tab_ref[i_idx, :]
        return carry

    lax.fori_loop(0, tb, gather_row, 0, unroll=8)

    # Vectorized rating: elementwise product + lane reduction, stored
    # lane-dense as a (1, tb) row (unmasked store).
    u = usrc_ref[...]
    i = isrc_ref[...]
    r_ref[...] = jnp.sum(u * i, axis=1)[None, :]


def libmf_forward(user_emb, item_emb, users_index, items_index, block_rows=512):
    """Pallas implementation of LibMF.forward.

    user_emb: (n_users, F) f32, item_emb: (n_items, F) f32,
    users_index / items_index: (B,) int.
    Returns (R_h (B,), user_src (B, F), item_src (B, F)).
    """
    B = users_index.shape[0]
    n_users, F = user_emb.shape
    n_items = item_emb.shape[0]

    # Rows per grid step: multiple of 8 (sublane), capped at block_rows so big
    # batches still produce num_blocks >= 2 for megacore sharding while tiny
    # batches stay single-step.
    tb = min(_round_up(block_rows, 8), _round_up(B, 8))
    b_pad = _round_up(B, tb)
    num_blocks = b_pad // tb

    # VMEM budget guard for the whole-table-resident path (lane dim pads to
    # 128, sublane dim to 8).  Conservative wrt v7x's 64 MiB per-TC VMEM.
    lane_f = _round_up(F, 128)
    tab_bytes = (_round_up(n_users, 8) + _round_up(n_items, 8)) * lane_f * 4
    tile_bytes = 2 * (2 * tb * lane_f * 4) + 2 * _round_up(tb, 128) * 4  # dbl-buffered out tiles
    if tab_bytes + tile_bytes > (56 << 20):
        # TODO(synk): DMA row-gather fallback for tables that exceed VMEM.
        raise NotImplementedError("embedding tables too large for VMEM-resident path")
    vmem_limit = int(min(max(tab_bytes + tile_bytes + (4 << 20), 32 << 20), 64 << 20))

    # Padded, scalar-prefetched index vectors (tail rows gather row 0; their
    # outputs are sliced off below).
    u_idx = jnp.pad(users_index.astype(jnp.int32), (0, b_pad - B))
    i_idx = jnp.pad(items_index.astype(jnp.int32), (0, b_pad - B))

    grid_spec = pltpu.PrefetchScalarGridSpec(
        num_scalar_prefetch=2,
        grid=(num_blocks,),
        in_specs=[
            pl.BlockSpec(memory_space=pltpu.MemorySpace.VMEM),   # user table (whole)
            pl.BlockSpec(memory_space=pltpu.MemorySpace.VMEM),   # item table (whole)
        ],
        out_specs=[
            pl.BlockSpec((1, tb), lambda b, u, i: (0, b)),       # R_h, lane-dense row
            pl.BlockSpec((tb, F), lambda b, u, i: (b, 0)),       # user_src tile
            pl.BlockSpec((tb, F), lambda b, u, i: (b, 0)),       # item_src tile
        ],
    )

    r_row, user_src, item_src = pl.pallas_call(
        _mf_kernel,
        grid_spec=grid_spec,
        out_shape=(
            jax.ShapeDtypeStruct((1, b_pad), jnp.float32),
            jax.ShapeDtypeStruct((b_pad, F), jnp.float32),
            jax.ShapeDtypeStruct((b_pad, F), jnp.float32),
        ),
        compiler_params=pltpu.CompilerParams(
            dimension_semantics=("parallel",),     # batch blocks are independent
            vmem_limit_bytes=vmem_limit),
    )(u_idx, i_idx, user_emb, item_emb)

    return r_row[0, :B], user_src[:B], item_src[:B]


if __name__ == "__main__":
    # Module hyper-parameters (small, consistent with LibMF.__init__ defaults)
    n_users, n_items, n_factors = 32, 48, 20
    batch = 8

    # Deterministic parameter init (mimics 0.1 * rand(n, F), synthetic weights).
    key = jax.random.PRNGKey(0)
    k_u, k_i, k_ui, k_ii = jax.random.split(key, 4)
    user_emb = 0.1 * jax.random.uniform(k_u, (n_users, n_factors), dtype=jnp.float32)
    item_emb = 0.1 * jax.random.uniform(k_i, (n_items, n_factors), dtype=jnp.float32)

    users_index = jax.random.randint(k_ui, (batch,), 0, n_users, dtype=jnp.int32)
    items_index = jax.random.randint(k_ii, (batch,), 0, n_items, dtype=jnp.int32)

    r_h, user_src, item_src = libmf_forward(user_emb, item_emb,
                                            users_index, items_index)
    jax.block_until_ready((r_h, user_src, item_src))

    # Pure-JAX reference check
    u_ref = user_emb[users_index]
    i_ref = item_emb[items_index]
    r_ref = jnp.sum(u_ref * i_ref, axis=1)
    assert np.allclose(np.asarray(user_src), np.asarray(u_ref), atol=1e-6)
    assert np.allclose(np.asarray(item_src), np.asarray(i_ref), atol=1e-6)
    assert np.allclose(np.asarray(r_h), np.asarray(r_ref), atol=1e-6)

    print("KERNEL_OK")
</pallas_src>

<mosaic_0001>
module attributes {stable_mosaic.version = 11 : i64} {
  func.func @_mf_kernel(%arg0: i32, %arg1: memref<8xi32, #tpu.memory_space<smem>>, %arg2: memref<8xi32, #tpu.memory_space<smem>>, %arg3: memref<32x20xf32, #tpu.memory_space<vmem>>, %arg4: memref<48x20xf32, #tpu.memory_space<vmem>>, %arg5: memref<1x8xf32, #tpu.memory_space<vmem>>, %arg6: memref<8x20xf32, #tpu.memory_space<vmem>>, %arg7: memref<8x20xf32, #tpu.memory_space<vmem>>) attributes {dimension_semantics = [#tpu.dimension_semantics<parallel>], iteration_bounds = array<i64: 1>, scalar_prefetch = 2 : i64, scratch_operands = 0 : i64, tpu.core_type = #tpu.core_type<tc>, window_params = [{pipeline_mode = #tpu.pipeline_mode<synchronous>, transform_indices = @transform_0, window_bounds = array<i64: 32, 20>}, {pipeline_mode = #tpu.pipeline_mode<synchronous>, transform_indices = @transform_1, window_bounds = array<i64: 48, 20>}, {transform_indices = @transform_2, window_bounds = array<i64: 1, 8>}, {transform_indices = @transform_3, window_bounds = array<i64: 8, 20>}, {transform_indices = @transform_4, window_bounds = array<i64: 8, 20>}]} {
    %c8_i32 = arith.constant 8 : i32
    %0 = arith.muli %arg0, %c8_i32 : i32
    %c0_i32 = arith.constant 0 : i32
    %1 = arith.addi %0, %c0_i32 : i32
    %2 = arith.index_cast %1 : i32 to index
    %3 = memref.load %arg1[%2] : memref<8xi32, #tpu.memory_space<smem>>
    %4 = arith.addi %0, %c0_i32 : i32
    %5 = arith.index_cast %4 : i32 to index
    %6 = memref.load %arg2[%5] : memref<8xi32, #tpu.memory_space<smem>>
    %7 = arith.index_cast %3 : i32 to index
    %c0 = arith.constant 0 : index
    %8 = vector.load %arg3[%7, %c0] : memref<32x20xf32, #tpu.memory_space<vmem>>, vector<1x20xf32>
    %9 = vector.shape_cast %8 : vector<1x20xf32> to vector<20xf32>
    %10 = arith.index_cast %c0_i32 : i32 to index
    %c0_0 = arith.constant 0 : index
    %11 = vector.load %arg6[%10, %c0_0] : memref<8x20xf32, #tpu.memory_space<vmem>>, vector<1x20xf32>
    %12 = vector.shape_cast %11 : vector<1x20xf32> to vector<20xf32>
    %13 = vector.shape_cast %9 : vector<20xf32> to vector<1x20xf32>
    tpu.vector_store %arg6[%10, %c0_0], %13 {strides = array<i32>} : memref<8x20xf32, #tpu.memory_space<vmem>>, vector<1x20xf32>,
    %14 = arith.index_cast %6 : i32 to index
    %c0_1 = arith.constant 0 : index
    %15 = vector.load %arg4[%14, %c0_1] : memref<48x20xf32, #tpu.memory_space<vmem>>, vector<1x20xf32>
    %16 = vector.shape_cast %15 : vector<1x20xf32> to vector<20xf32>
    %17 = arith.index_cast %c0_i32 : i32 to index
    %c0_2 = arith.constant 0 : index
    %18 = vector.load %arg7[%17, %c0_2] : memref<8x20xf32, #tpu.memory_space<vmem>>, vector<1x20xf32>
    %19 = vector.shape_cast %18 : vector<1x20xf32> to vector<20xf32>
    %20 = vector.shape_cast %16 : vector<20xf32> to vector<1x20xf32>
    tpu.vector_store %arg7[%17, %c0_2], %20 {strides = array<i32>} : memref<8x20xf32, #tpu.memory_space<vmem>>, vector<1x20xf32>,
    %c1_i32 = arith.constant 1 : i32
    %21 = arith.addi %0, %c1_i32 : i32
    %22 = arith.index_cast %21 : i32 to index
    %23 = memref.load %arg1[%22] : memref<8xi32, #tpu.memory_space<smem>>
    %24 = arith.addi %0, %c1_i32 : i32
    %25 = arith.index_cast %24 : i32 to index
    %26 = memref.load %arg2[%25] : memref<8xi32, #tpu.memory_space<smem>>
    %27 = arith.index_cast %23 : i32 to index
    %c0_3 = arith.constant 0 : index
    %28 = vector.load %arg3[%27, %c0_3] : memref<32x20xf32, #tpu.memory_space<vmem>>, vector<1x20xf32>
    %29 = vector.shape_cast %28 : vector<1x20xf32> to vector<20xf32>
    %30 = arith.index_cast %c1_i32 : i32 to index
    %c0_4 = arith.constant 0 : index
    %31 = vector.load %arg6[%30, %c0_4] : memref<8x20xf32, #tpu.memory_space<vmem>>, vector<1x20xf32>
    %32 = vector.shape_cast %31 : vector<1x20xf32> to vector<20xf32>
    %33 = vector.shape_cast %29 : vector<20xf32> to vector<1x20xf32>
    tpu.vector_store %arg6[%30, %c0_4], %33 {strides = array<i32>} : memref<8x20xf32, #tpu.memory_space<vmem>>, vector<1x20xf32>,
    %34 = arith.index_cast %26 : i32 to index
    %c0_5 = arith.constant 0 : index
    %35 = vector.load %arg4[%34, %c0_5] : memref<48x20xf32, #tpu.memory_space<vmem>>, vector<1x20xf32>
    %36 = vector.shape_cast %35 : vector<1x20xf32> to vector<20xf32>
    %37 = arith.index_cast %c1_i32 : i32 to index
    %c0_6 = arith.constant 0 : index
    %38 = vector.load %arg7[%37, %c0_6] : memref<8x20xf32, #tpu.memory_space<vmem>>, vector<1x20xf32>
    %39 = vector.shape_cast %38 : vector<1x20xf32> to vector<20xf32>
    %40 = vector.shape_cast %36 : vector<20xf32> to vector<1x20xf32>
    tpu.vector_store %arg7[%37, %c0_6], %40 {strides = array<i32>} : memref<8x20xf32, #tpu.memory_space<vmem>>, vector<1x20xf32>,
    %c2_i32 = arith.constant 2 : i32
    %41 = arith.addi %0, %c2_i32 : i32
    %42 = arith.index_cast %41 : i32 to index
    %43 = memref.load %arg1[%42] : memref<8xi32, #tpu.memory_space<smem>>
    %44 = arith.addi %0, %c2_i32 : i32
    %45 = arith.index_cast %44 : i32 to index
    %46 = memref.load %arg2[%45] : memref<8xi32, #tpu.memory_space<smem>>
    %47 = arith.index_cast %43 : i32 to index
    %c0_7 = arith.constant 0 : index
    %48 = vector.load %arg3[%47, %c0_7] : memref<32x20xf32, #tpu.memory_space<vmem>>, vector<1x20xf32>
    %49 = vector.shape_cast %48 : vector<1x20xf32> to vector<20xf32>
    %50 = arith.index_cast %c2_i32 : i32 to index
    %c0_8 = arith.constant 0 : index
    %51 = vector.load %arg6[%50, %c0_8] : memref<8x20xf32, #tpu.memory_space<vmem>>, vector<1x20xf32>
    %52 = vector.shape_cast %51 : vector<1x20xf32> to vector<20xf32>
    %53 = vector.shape_cast %49 : vector<20xf32> to vector<1x20xf32>
    tpu.vector_store %arg6[%50, %c0_8], %53 {strides = array<i32>} : memref<8x20xf32, #tpu.memory_space<vmem>>, vector<1x20xf32>,
    %54 = arith.index_cast %46 : i32 to index
    %c0_9 = arith.constant 0 : index
    %55 = vector.load %arg4[%54, %c0_9] : memref<48x20xf32, #tpu.memory_space<vmem>>, vector<1x20xf32>
    %56 = vector.shape_cast %55 : vector<1x20xf32> to vector<20xf32>
    %57 = arith.index_cast %c2_i32 : i32 to index
    %c0_10 = arith.constant 0 : index
    %58 = vector.load %arg7[%57, %c0_10] : memref<8x20xf32, #tpu.memory_space<vmem>>, vector<1x20xf32>
    %59 = vector.shape_cast %58 : vector<1x20xf32> to vector<20xf32>
    %60 = vector.shape_cast %56 : vector<20xf32> to vector<1x20xf32>
    tpu.vector_store %arg7[%57, %c0_10], %60 {strides = array<i32>} : memref<8x20xf32, #tpu.memory_space<vmem>>, vector<1x20xf32>,
    %c3_i32 = arith.constant 3 : i32
    %61 = arith.addi %0, %c3_i32 : i32
    %62 = arith.index_cast %61 : i32 to index
    %63 = memref.load %arg1[%62] : memref<8xi32, #tpu.memory_space<smem>>
    %64 = arith.addi %0, %c3_i32 : i32
    %65 = arith.index_cast %64 : i32 to index
    %66 = memref.load %arg2[%65] : memref<8xi32, #tpu.memory_space<smem>>
    %67 = arith.index_cast %63 : i32 to index
    %c0_11 = arith.constant 0 : index
    %68 = vector.load %arg3[%67, %c0_11] : memref<32x20xf32, #tpu.memory_space<vmem>>, vector<1x20xf32>
    %69 = vector.shape_cast %68 : vector<1x20xf32> to vector<20xf32>
    %70 = arith.index_cast %c3_i32 : i32 to index
    %c0_12 = arith.constant 0 : index
    %71 = vector.load %arg6[%70, %c0_12] : memref<8x20xf32, #tpu.memory_space<vmem>>, vector<1x20xf32>
    %72 = vector.shape_cast %71 : vector<1x20xf32> to vector<20xf32>
    %73 = vector.shape_cast %69 : vector<20xf32> to vector<1x20xf32>
    tpu.vector_store %arg6[%70, %c0_12], %73 {strides = array<i32>} : memref<8x20xf32, #tpu.memory_space<vmem>>, vector<1x20xf32>,
    %74 = arith.index_cast %66 : i32 to index
    %c0_13 = arith.constant 0 : index
    %75 = vector.load %arg4[%74, %c0_13] : memref<48x20xf32, #tpu.memory_space<vmem>>, vector<1x20xf32>
    %76 = vector.shape_cast %75 : vector<1x20xf32> to vector<20xf32>
    %77 = arith.index_cast %c3_i32 : i32 to index
    %c0_14 = arith.constant 0 : index
    %78 = vector.load %arg7[%77, %c0_14] : memref<8x20xf32, #tpu.memory_space<vmem>>, vector<1x20xf32>
    %79 = vector.shape_cast %78 : vector<1x20xf32> to vector<20xf32>
    %80 = vector.shape_cast %76 : vector<20xf32> to vector<1x20xf32>
    tpu.vector_store %arg7[%77, %c0_14], %80 {strides = array<i32>} : memref<8x20xf32, #tpu.memory_space<vmem>>, vector<1x20xf32>,
    %c4_i32 = arith.constant 4 : i32
    %81 = arith.addi %0, %c4_i32 : i32
    %82 = arith.index_cast %81 : i32 to index
    %83 = memref.load %arg1[%82] : memref<8xi32, #tpu.memory_space<smem>>
    %84 = arith.addi %0, %c4_i32 : i32
    %85 = arith.index_cast %84 : i32 to index
    %86 = memref.load %arg2[%85] : memref<8xi32, #tpu.memory_space<smem>>
    %87 = arith.index_cast %83 : i32 to index
    %c0_15 = arith.constant 0 : index
    %88 = vector.load %arg3[%87, %c0_15] : memref<32x20xf32, #tpu.memory_space<vmem>>, vector<1x20xf32>
    %89 = vector.shape_cast %88 : vector<1x20xf32> to vector<20xf32>
    %90 = arith.index_cast %c4_i32 : i32 to index
    %c0_16 = arith.constant 0 : index
    %91 = vector.load %arg6[%90, %c0_16] : memref<8x20xf32, #tpu.memory_space<vmem>>, vector<1x20xf32>
    %92 = vector.shape_cast %91 : vector<1x20xf32> to vector<20xf32>
    %93 = vector.shape_cast %89 : vector<20xf32> to vector<1x20xf32>
    tpu.vector_store %arg6[%90, %c0_16], %93 {strides = array<i32>} : memref<8x20xf32, #tpu.memory_space<vmem>>, vector<1x20xf32>,
    %94 = arith.index_cast %86 : i32 to index
    %c0_17 = arith.constant 0 : index
    %95 = vector.load %arg4[%94, %c0_17] : memref<48x20xf32, #tpu.memory_space<vmem>>, vector<1x20xf32>
    %96 = vector.shape_cast %95 : vector<1x20xf32> to vector<20xf32>
    %97 = arith.index_cast %c4_i32 : i32 to index
    %c0_18 = arith.constant 0 : index
    %98 = vector.load %arg7[%97, %c0_18] : memref<8x20xf32, #tpu.memory_space<vmem>>, vector<1x20xf32>
    %99 = vector.shape_cast %98 : vector<1x20xf32> to vector<20xf32>
    %100 = vector.shape_cast %96 : vector<20xf32> to vector<1x20xf32>
    tpu.vector_store %arg7[%97, %c0_18], %100 {strides = array<i32>} : memref<8x20xf32, #tpu.memory_space<vmem>>, vector<1x20xf32>,
    %c5_i32 = arith.constant 5 : i32
    %101 = arith.addi %0, %c5_i32 : i32
    %102 = arith.index_cast %101 : i32 to index
    %103 = memref.load %arg1[%102] : memref<8xi32, #tpu.memory_space<smem>>
    %104 = arith.addi %0, %c5_i32 : i32
    %105 = arith.index_cast %104 : i32 to index
    %106 = memref.load %arg2[%105] : memref<8xi32, #tpu.memory_space<smem>>
    %107 = arith.index_cast %103 : i32 to index
    %c0_19 = arith.constant 0 : index
    %108 = vector.load %arg3[%107, %c0_19] : memref<32x20xf32, #tpu.memory_space<vmem>>, vector<1x20xf32>
    %109 = vector.shape_cast %108 : vector<1x20xf32> to vector<20xf32>
    %110 = arith.index_cast %c5_i32 : i32 to index
    %c0_20 = arith.constant 0 : index
    %111 = vector.load %arg6[%110, %c0_20] : memref<8x20xf32, #tpu.memory_space<vmem>>, vector<1x20xf32>
    %112 = vector.shape_cast %111 : vector<1x20xf32> to vector<20xf32>
    %113 = vector.shape_cast %109 : vector<20xf32> to vector<1x20xf32>
    tpu.vector_store %arg6[%110, %c0_20], %113 {strides = array<i32>} : memref<8x20xf32, #tpu.memory_space<vmem>>, vector<1x20xf32>,
    %114 = arith.index_cast %106 : i32 to index
    %c0_21 = arith.constant 0 : index
    %115 = vector.load %arg4[%114, %c0_21] : memref<48x20xf32, #tpu.memory_space<vmem>>, vector<1x20xf32>
    %116 = vector.shape_cast %115 : vector<1x20xf32> to vector<20xf32>
    %117 = arith.index_cast %c5_i32 : i32 to index
    %c0_22 = arith.constant 0 : index
    %118 = vector.load %arg7[%117, %c0_22] : memref<8x20xf32, #tpu.memory_space<vmem>>, vector<1x20xf32>
    %119 = vector.shape_cast %118 : vector<1x20xf32> to vector<20xf32>
    %120 = vector.shape_cast %116 : vector<20xf32> to vector<1x20xf32>
    tpu.vector_store %arg7[%117, %c0_22], %120 {strides = array<i32>} : memref<8x20xf32, #tpu.memory_space<vmem>>, vector<1x20xf32>,
    %c6_i32 = arith.constant 6 : i32
    %121 = arith.addi %0, %c6_i32 : i32
    %122 = arith.index_cast %121 : i32 to index
    %123 = memref.load %arg1[%122] : memref<8xi32, #tpu.memory_space<smem>>
    %124 = arith.addi %0, %c6_i32 : i32
    %125 = arith.index_cast %124 : i32 to index
    %126 = memref.load %arg2[%125] : memref<8xi32, #tpu.memory_space<smem>>
    %127 = arith.index_cast %123 : i32 to index
    %c0_23 = arith.constant 0 : index
    %128 = vector.load %arg3[%127, %c0_23] : memref<32x20xf32, #tpu.memory_space<vmem>>, vector<1x20xf32>
    %129 = vector.shape_cast %128 : vector<1x20xf32> to vector<20xf32>
    %130 = arith.index_cast %c6_i32 : i32 to index
    %c0_24 = arith.constant 0 : index
    %131 = vector.load %arg6[%130, %c0_24] : memref<8x20xf32, #tpu.memory_space<vmem>>, vector<1x20xf32>
    %132 = vector.shape_cast %131 : vector<1x20xf32> to vector<20xf32>
    %133 = vector.shape_cast %129 : vector<20xf32> to vector<1x20xf32>
    tpu.vector_store %arg6[%130, %c0_24], %133 {strides = array<i32>} : memref<8x20xf32, #tpu.memory_space<vmem>>, vector<1x20xf32>,
    %134 = arith.index_cast %126 : i32 to index
    %c0_25 = arith.constant 0 : index
    %135 = vector.load %arg4[%134, %c0_25] : memref<48x20xf32, #tpu.memory_space<vmem>>, vector<1x20xf32>
    %136 = vector.shape_cast %135 : vector<1x20xf32> to vector<20xf32>
    %137 = arith.index_cast %c6_i32 : i32 to index
    %c0_26 = arith.constant 0 : index
    %138 = vector.load %arg7[%137, %c0_26] : memref<8x20xf32, #tpu.memory_space<vmem>>, vector<1x20xf32>
    %139 = vector.shape_cast %138 : vector<1x20xf32> to vector<20xf32>
    %140 = vector.shape_cast %136 : vector<20xf32> to vector<1x20xf32>
    tpu.vector_store %arg7[%137, %c0_26], %140 {strides = array<i32>} : memref<8x20xf32, #tpu.memory_space<vmem>>, vector<1x20xf32>,
    %c7_i32 = arith.constant 7 : i32
    %141 = arith.addi %0, %c7_i32 : i32
    %142 = arith.index_cast %141 : i32 to index
    %143 = memref.load %arg1[%142] : memref<8xi32, #tpu.memory_space<smem>>
    %144 = arith.addi %0, %c7_i32 : i32
    %145 = arith.index_cast %144 : i32 to index
    %146 = memref.load %arg2[%145] : memref<8xi32, #tpu.memory_space<smem>>
    %147 = arith.index_cast %143 : i32 to index
    %c0_27 = arith.constant 0 : index
    %148 = vector.load %arg3[%147, %c0_27] : memref<32x20xf32, #tpu.memory_space<vmem>>, vector<1x20xf32>
    %149 = vector.shape_cast %148 : vector<1x20xf32> to vector<20xf32>
    %150 = arith.index_cast %c7_i32 : i32 to index
    %c0_28 = arith.constant 0 : index
    %151 = vector.load %arg6[%150, %c0_28] : memref<8x20xf32, #tpu.memory_space<vmem>>, vector<1x20xf32>
    %152 = vector.shape_cast %151 : vector<1x20xf32> to vector<20xf32>
    %153 = vector.shape_cast %149 : vector<20xf32> to vector<1x20xf32>
    tpu.vector_store %arg6[%150, %c0_28], %153 {strides = array<i32>} : memref<8x20xf32, #tpu.memory_space<vmem>>, vector<1x20xf32>,
    %154 = arith.index_cast %146 : i32 to index
    %c0_29 = arith.constant 0 : index
    %155 = vector.load %arg4[%154, %c0_29] : memref<48x20xf32, #tpu.memory_space<vmem>>, vector<1x20xf32>
    %156 = vector.shape_cast %155 : vector<1x20xf32> to vector<20xf32>
    %157 = arith.index_cast %c7_i32 : i32 to index
    %c0_30 = arith.constant 0 : index
    %158 = vector.load %arg7[%157, %c0_30] : memref<8x20xf32, #tpu.memory_space<vmem>>, vector<1x20xf32>
    %159 = vector.shape_cast %158 : vector<1x20xf32> to vector<20xf32>
    %160 = vector.shape_cast %156 : vector<20xf32> to vector<1x20xf32>
    tpu.vector_store %arg7[%157, %c0_30], %160 {strides = array<i32>} : memref<8x20xf32, #tpu.memory_space<vmem>>, vector<1x20xf32>,
    %c8_i32_31 = arith.constant 8 : i32
    %c0_32 = arith.constant 0 : index
    %c0_33 = arith.constant 0 : index
    %161 = vector.load %arg6[%c0_32, %c0_33] : memref<8x20xf32, #tpu.memory_space<vmem>>, vector<8x20xf32>
    %c0_34 = arith.constant 0 : index
    %c0_35 = arith.constant 0 : index
    %162 = vector.load %arg7[%c0_34, %c0_35] : memref<8x20xf32, #tpu.memory_space<vmem>>, vector<8x20xf32>
    %163 = arith.mulf %161, %162 : vector<8x20xf32>
    %cst = arith.constant dense<0.000000e+00> : vector<8xf32>
    %164 = vector.multi_reduction <add>, %163, %cst [1] : vector<8x20xf32> to vector<8xf32>
    %165 = vector.shape_cast %164 : vector<8xf32> to vector<1x8xf32>
    %c0_36 = arith.constant 0 : index
    %c0_37 = arith.constant 0 : index
    %166 = vector.load %arg5[%c0_36, %c0_37] : memref<1x8xf32, #tpu.memory_space<vmem>>, vector<1x8xf32>
    tpu.vector_store %arg5[%c0_36, %c0_37], %165 {strides = array<i32>} : memref<1x8xf32, #tpu.memory_space<vmem>>, vector<1x8xf32>,
    return
  }
  func.func @transform_0(%arg0: i32, %arg1: memref<8xi32, #tpu.memory_space<smem>>, %arg2: memref<8xi32, #tpu.memory_space<smem>>) -> (i32, i32) {
    %c0_i32 = arith.constant 0 : i32
    %c0_i32_0 = arith.constant 0 : i32
    %c0_i32_1 = arith.constant 0 : i32
    return %c0_i32, %c0_i32_0 : i32, i32
  }
  func.func @transform_1(%arg0: i32, %arg1: memref<8xi32, #tpu.memory_space<smem>>, %arg2: memref<8xi32, #tpu.memory_space<smem>>) -> (i32, i32) {
    %c0_i32 = arith.constant 0 : i32
    %c0_i32_0 = arith.constant 0 : i32
    %c0_i32_1 = arith.constant 0 : i32
    return %c0_i32, %c0_i32_0 : i32, i32
  }
  func.func @transform_2(%arg0: i32, %arg1: memref<8xi32, #tpu.memory_space<smem>>, %arg2: memref<8xi32, #tpu.memory_space<smem>>) -> (i32, i32) {
    %c0_i32 = arith.constant 0 : i32
    %c0_i32_0 = arith.constant 0 : i32
    return %c0_i32, %arg0 : i32, i32
  }
  func.func @transform_3(%arg0: i32, %arg1: memref<8xi32, #tpu.memory_space<smem>>, %arg2: memref<8xi32, #tpu.memory_space<smem>>) -> (i32, i32) {
    %c0_i32 = arith.constant 0 : i32
    %c0_i32_0 = arith.constant 0 : i32
    return %arg0, %c0_i32 : i32, i32
  }
  func.func @transform_4(%arg0: i32, %arg1: memref<8xi32, #tpu.memory_space<smem>>, %arg2: memref<8xi32, #tpu.memory_space<smem>>) -> (i32, i32) {
    %c0_i32 = arith.constant 0 : i32
    %c0_i32_0 = arith.constant 0 : i32
    return %arg0, %c0_i32 : i32, i32
  }
}

</mosaic_0001>

<bundles_post_ra>
// kernel: tpu_custom_call.1
= control target key start
LH: loop header
LB: loop body
LE: loop exit
PB: predicated region body
PF: predicated region fallthrough
CT: control target
= control target key end

     0   :  { %s448_s0 = inlined_call_operand.vmem [shape: s32[8], index: 0, kind: input, shape index: {}]   ;;  %s449_s2 = inlined_call_operand.vmem [shape: f32[32,20], index: 2, kind: input, shape index: {}]   ;;  %s450_s3 = inlined_call_operand.vmem [shape: f32[48,20], index: 3, kind: input, shape index: {}]   ;;  %s451_s4 = inlined_call_operand.hbm [shape: f32[1,8], index: 4, kind: output, shape index: {0}]   ;;  %s452_s5 = inlined_call_operand.hbm [shape: f32[8,20], index: 5, kind: output, shape index: {1}]   ;;  %s453_s6 = inlined_call_operand.hbm [shape: f32[8,20], index: 6, kind: output, shape index: {2}]   ;;  %s454_s1 = inlined_call_operand.vmem [shape: s32[8], index: 1, kind: input, shape index: {}]  }
   0x1   :  { %s12_s23 = sshll.u32 %s448_s0, 4  ;;  %s16_s26 = sshll.u32 %s454_s1, 4  ;;  %s13_s23 = int_to_ptr.vmem [resolvable:$true] %s12_s23  ;;  %s17_s26 = int_to_ptr.vmem [resolvable:$true] %s16_s26 }
   0x2   :  { %s194_s27 = scalar_lea.vmem %s13_s23, 16  ;;  %p199_p1 = scmp.lt.s32.totalorder %s13_s23, %s13_s23 }
   0x3   :  { %p195_p0 = scmp.ne.s32.totalorder %s13_s23, %s194_s27  ;;  %p200_p2 = scmp.lt.s32.totalorder %s194_s27, %s194_s27 }
   0x5   :  { %p201_p3 = por %p200_p2, %p199_p1 }
   0x7   :  { %p202_p4 = pnand %p201_p3, %p195_p0 }
   0x9   :  { %205 = shalt.err (!%p202_p4)  }
   0xa   :  { %s290_s28 = smov [#allocation3]   ;;  %s206_s29 = scalar_lea.vmem %s17_s26, 16 }
   0xb   :  { %15 = dma.vmem_to_smem %s13_s23, 16, %s290_s28, [#allocation2] }
   0xc   :  { %p207_p5 = scmp.ne.s32.totalorder %s17_s26, %s206_s29  ;;  %p211_p6 = scmp.lt.s32.totalorder %s17_s26, %s17_s26 }
   0xd   :  { %p212_p7 = scmp.lt.s32.totalorder %s206_s29, %s206_s29 }
   0xf   :  { %p213_p8 = por %p212_p7, %p211_p6 }
  0x11   :  { %p214_p9 = pnand %p213_p8, %p207_p5 }
  0x13   :  { %217 = shalt.err (!%p214_p9)  }
  0x14   :  { %s291_s0 = smov [#allocation4]  }
  0x15   :  { %19 = dma.vmem_to_smem %s17_s26, 16, %s291_s0, [#allocation2] }
  0x16   :  { %284 = dma.done.wait [#allocation2], 32 }
  0x17   :  { %285 = vsyncadd [#allocation2], 4294967264 }
  0x18   :  { %21 = sfence }
  0x19   :  { %22 = vsyncpa [#allocation6], 0  ;;  %s29_s1 = sld [smem:[#allocation3]]  ;;  %s175_s7 = sld [smem:[#allocation3 + $0x1]] }
  0x1a   :  { %s30_s30 = sld [smem:[#allocation4]]  ;;  %s176_s8 = sld [smem:[#allocation4 + $0x1]] }
  0x1b   :  { %23 = vsyncpa [#allocation8], 0  ;;  %s177_s9 = sld [smem:[#allocation3 + $0x2]]  ;;  %s179_s11 = sld [smem:[#allocation3 + $0x3]]  ;;  %vm33_vm0 = vcmask 155648   ;;  %vm104_vm1 = vcmask 162816  }
  0x1c   :  { %s178_s10 = sld [smem:[#allocation4 + $0x2]]  ;;  %s180_s12 = sld [smem:[#allocation4 + $0x3]] }
  0x1d   :  { %s336_s13 = sld [smem:[#allocation3 + $0x4]]  ;;  %s340_s15 = sld [smem:[#allocation3 + $0x5]] }
  0x1e   :  { %s338_s14 = sld [smem:[#allocation4 + $0x4]]  ;;  %s342_s16 = sld [smem:[#allocation4 + $0x5]] }
  0x1f   :  { %s31_s19 = scalar_lea.vmem %s449_s2, %s29_s1  ;;  %s41_s25 = scalar_lea.vmem %s449_s2, %s175_s7 }
  0x20   :  { %s35_s22 = scalar_lea.vmem %s450_s3, %s30_s30  ;;  %v32_v0 = vld [vmem:[%s31_s19] sm:$0x1]  ;;  %s44_s28 = scalar_lea.vmem %s450_s3, %s176_s8 }
  0x21   :  { %v36_v1 = vld [vmem:[%s35_s22] sm:$0x1]  ;;  %34 = vst.msk [vmem:[#allocation7] sm:$0x1] %vm33_vm0, %v32_v0  ;;  %s50_s1 = scalar_lea.vmem %s449_s2, %s177_s9  ;;  %s59_s19 = scalar_lea.vmem %s449_s2, %s179_s11 }
  0x22   :  { %37 = vst.msk [vmem:[#allocation9] sm:$0x1] %vm33_vm0, %v36_v1  ;;  %v42_v2 = vld [vmem:[%s41_s25] sm:$0x1]  ;;  %s53_s7 = scalar_lea.vmem %s450_s3, %s178_s10  ;;  %s62_s9 = scalar_lea.vmem %s450_s3, %s180_s12 }
  0x23   :  { %v45_v3 = vld [vmem:[%s44_s28] sm:$0x1]  ;;  %43 = vst.msk [vmem:[#allocation7 + $0x1] sm:$0x1] %vm33_vm0, %v42_v2  ;;  %s68_s23 = scalar_lea.vmem %s449_s2, %s336_s13  ;;  %s77_s27 = scalar_lea.vmem %s449_s2, %s340_s15 }
  0x24   :  { %46 = vst.msk [vmem:[#allocation9 + $0x1] sm:$0x1] %vm33_vm0, %v45_v3  ;;  %v51_v4 = vld [vmem:[%s50_s1] sm:$0x1]  ;;  %s71_s26 = scalar_lea.vmem %s450_s3, %s338_s14  ;;  %s80_s0 = scalar_lea.vmem %s450_s3, %s342_s16 }
  0x25   :  { %v54_v5 = vld [vmem:[%s53_s7] sm:$0x1]  ;;  %52 = vst.msk [vmem:[#allocation7 + $0x2] sm:$0x1] %vm33_vm0, %v51_v4  ;;  %s185_s13 = sld [smem:[#allocation3 + $0x6]]  ;;  %s187_s1 = sld [smem:[#allocation3 + $0x7]] }
  0x26   :  { %55 = vst.msk [vmem:[#allocation9 + $0x2] sm:$0x1] %vm33_vm0, %v54_v5  ;;  %v60_v6 = vld [vmem:[%s59_s19] sm:$0x1]  ;;  %s186_s14 = sld [smem:[#allocation4 + $0x6]]  ;;  %s188_s30 = sld [smem:[#allocation4 + $0x7]] }
  0x27   :  { %v63_v7 = vld [vmem:[%s62_s9] sm:$0x1]  ;;  %61 = vst.msk [vmem:[#allocation7 + $0x3] sm:$0x1] %vm33_vm0, %v60_v6 }
  0x28   :  { %64 = vst.msk [vmem:[#allocation9 + $0x3] sm:$0x1] %vm33_vm0, %v63_v7  ;;  %v69_v8 = vld [vmem:[%s68_s23] sm:$0x1] }
  0x29   :  { %v72_v9 = vld [vmem:[%s71_s26] sm:$0x1]  ;;  %70 = vst.msk [vmem:[#allocation7 + $0x4] sm:$0x1] %vm33_vm0, %v69_v8 }
  0x2a   :  { %73 = vst.msk [vmem:[#allocation9 + $0x4] sm:$0x1] %vm33_vm0, %v72_v9  ;;  %v78_v10 = vld [vmem:[%s77_s27] sm:$0x1] }
  0x2b   :  { %v81_v11 = vld [vmem:[%s80_s0] sm:$0x1]  ;;  %79 = vst.msk [vmem:[#allocation7 + $0x5] sm:$0x1] %vm33_vm0, %v78_v10  ;;  %s86_s7 = scalar_lea.vmem %s449_s2, %s185_s13  ;;  %s95_s21 = scalar_lea.vmem %s449_s2, %s187_s1 }
  0x2c   :  { %82 = vst.msk [vmem:[#allocation9 + $0x5] sm:$0x1] %vm33_vm0, %v81_v11  ;;  %v87_v12 = vld [vmem:[%s86_s7] sm:$0x1]  ;;  %s89_s18 = scalar_lea.vmem %s450_s3, %s186_s14  ;;  %s98_s22 = scalar_lea.vmem %s450_s3, %s188_s30 }
  0x2d   :  { %88 = vst.msk [vmem:[#allocation7 + $0x6] sm:$0x1] %vm33_vm0, %v87_v12  ;;  %v90_v13 = vld [vmem:[%s89_s18] sm:$0x1]  ;;  %s292_s2 = smov [#allocation7]  }
  0x2e   :  { %v96_v14 = vld [vmem:[%s95_s21] sm:$0x1]  ;;  %91 = vst.msk [vmem:[#allocation9 + $0x6] sm:$0x1] %vm33_vm0, %v90_v13  ;;  %s134_s23 = sshll.u32 %s292_s2, 4  ;;  %s135_s23 = int_to_ptr.vmem [resolvable:$true] %s134_s23 }
  0x2f   :  { %97 = vst.msk [vmem:[#allocation7 + $0x7] sm:$0x1] %vm33_vm0, %v96_v14  ;;  %v99_v15 = vld [vmem:[%s98_s22] sm:$0x1]  ;;  %s218_s24 = scalar_lea.vmem %s135_s23, 128  ;;  %p223_p11 = scmp.lt.s32.totalorder %s135_s23, %s135_s23 }
  0x30   :  { %100 = vst.msk [vmem:[#allocation9 + $0x7] sm:$0x1] %vm33_vm0, %v99_v15  ;;  %p219_p10 = scmp.ne.s32.totalorder %s135_s23, %s218_s24  ;;  %p224_p12 = scmp.lt.s32.totalorder %s218_s24, %s218_s24 }
  0x32   :  { %p225_p13 = por %p224_p12, %p223_p11 }
  0x34   :  { %p226_p0 = pnand %p225_p13, %p219_p10 }
  0x36   :  { %v101_v16 = vld [vmem:[#allocation7] sm:$0xff] }
  0x37   :  { %v102_v17 = vld [vmem:[#allocation9] sm:$0xff] }
  0x38   :  { %v103_v18 = vmul.f32 %v102_v17, %v101_v16 }
  0x3a   :  { %v105_v19 = vsel %vm104_vm1, %v103_v18, 0.0 }
  0x3b   :  { %106 = vadd.xlane.f32.xlu0 %v105_v19 }
  0x3c   :  { %229 = shalt.err (!%p226_p0)
}
  0x3d   :  { %s230_s26 = scalar_lea.hbm %s452_s5, 128 }
  0x3e   :  { %p231_p1 = scmp.ne.s32.totalorder %s452_s5, %s230_s26  ;;  %p234_p2 = scmp.lt.u32.totalorder %s230_s26, %s452_s5 }
  0x40   :  { %p236_p3 = pnand %p234_p2, %p231_p1 }
  0x42   :  { %239 = shalt.err (!%p236_p3)
}
  0x43   :  { %137 = dma.vmem_to_hbm [thread:$0]  %s135_s23, 128, %s452_s5, [#allocation8]  }
  0x44   :  { %s293_s13 = smov [#allocation9]  }
  0x45   :  { %s144_s14 = sshll.u32 %s293_s13, 4  ;;  %s145_s14 = int_to_ptr.vmem [resolvable:$true] %s144_s14 }
  0x46   :  { %s240_s1 = scalar_lea.vmem %s145_s14, 128  ;;  %p245_p5 = scmp.lt.s32.totalorder %s145_s14, %s145_s14 }
  0x47   :  { %p241_p4 = scmp.ne.s32.totalorder %s145_s14, %s240_s1  ;;  %p246_p6 = scmp.lt.s32.totalorder %s240_s1, %s240_s1 }
  0x49   :  { %p247_p7 = por %p246_p6, %p245_p5 }
  0x4b   :  { %p248_p8 = pnand %p247_p7, %p241_p4 }
  0x4d   :  { %251 = shalt.err (!%p248_p8)
}
  0x4e   :  { %s252_s15 = scalar_lea.hbm %s453_s6, 128 }
  0x4f   :  { %p253_p9 = scmp.ne.s32.totalorder %s453_s6, %s252_s15  ;;  %p256_p10 = scmp.lt.u32.totalorder %s252_s15, %s453_s6 }
  0x51   :  { %p258_p11 = pnand %p256_p10, %p253_p9 }
  0x53   :  { %261 = shalt.err (!%p258_p11)
}
  0x54   :  { %147 = dma.vmem_to_hbm [thread:$0]  %s145_s14, 128, %s453_s6, [#allocation8]   ;;  %v109_v20 = vlaneseq  ;;  %vm116_vm2 = vcmask 57344  }
  0x55   :  { %s294_s20 = smov [#allocation5]  }
  0x56   :  { %v110_v21 = vand.u32 127, %v109_v20  ;;  %v112_v22 = vshrl.u32 %v109_v20, 7  ;;  %s124_s21 = sshll.u32 %s294_s20, 4  ;;  %s125_s21 = int_to_ptr.vmem [resolvable:$true] %s124_s21 }
  0x57   :  { %s262_s9 = scalar_lea.vmem %s125_s21, 16  ;;  %s266_s10 = scalar_lea.vmem %s125_s21, 32 }
  0x58   :  { %v113_v23 = vsub.s32 %v110_v21, %v112_v22  ;;  %p263_p12 = scmp.ne.s32.totalorder %s125_s21, %s262_s9  ;;  %p267_p13 = scmp.lt.s32.totalorder %s125_s21, %s125_s21 }
  0x59   :  { %p268_p0 = scmp.lt.s32.totalorder %s266_s10, %s262_s9 }
  0x5b   :  { %p269_p1 = por %p268_p0, %p267_p13 }
  0x5d   :  { %p270_p2 = pnand %p269_p1, %p263_p12 }
  0xc8   :  { %v107_v24 = vpop.xlane.xlu0 %106 }
  0xc9   :  { %v114_v25 = vrot.slane %v107_v24, %v113_v23 }
  0xcb   :  { %117 = vst.msk [vmem:[#allocation5] sm:$0x1] %vm116_vm2, %v114_v25 }
  0xcc   :  { %273 = shalt.err (!%p270_p2)
}
  0xcd   :  { %s274_s2 = scalar_lea.hbm %s451_s4, 16 }
  0xce   :  { %p275_p3 = scmp.ne.s32.totalorder %s451_s4, %s274_s2  ;;  %p278_p4 = scmp.lt.u32.totalorder %s274_s2, %s451_s4 }
  0xd0   :  { %p280_p5 = pnand %p278_p4, %p275_p3 }
  0xd2   :  { %283 = shalt.err (!%p280_p5)
}
  0xd3   :  { %127 = dma.vmem_to_hbm [thread:$0]  %s125_s21, 16, %s451_s4, [#allocation6]  }
  0xd4   :  { %286 = dma.done.wait [#allocation6], 16  }
  0xd5   :  { %287 = vsyncadd [#allocation6], 4294967280 }
  0xd6   :  { %288 = dma.done.wait [#allocation8], 256  }
  0xd7   :  { %289 = vsyncadd [#allocation8], 4294967040 }
  0xd8   :  { %157 = vsyncpa [#allocation6], 1 }
  0xd9   :  { %158 = vsyncpa [#allocation8], 1 }

</bundles_post_ra>
